<compile_context>
chip_gen: v7x
topology: tpu7x:2x2x1
jax: 0.10.0
libtpu: 0.0.40
codegen_flags: <defaults>
</compile_context>

<pallas_src>
import functools

import numpy as np
import jax
import jax.numpy as jnp
from jax.experimental import pallas as pl
from jax.experimental.pallas import tpu as pltpu

_LANE = 128  # TPU lane width; pad the feature dim to a multiple of this.


def position_encoding_init(n_position, d_pos_vec):
    """Sinusoid position encoding table (matches the PyTorch reference)."""
    position_enc = np.array(
        [
            [pos / np.power(10000, 2 * i / d_pos_vec) for i in range(d_pos_vec)]
            if pos != 0
            else np.zeros(d_pos_vec)
            for pos in range(n_position)
        ]
    )
    position_enc[1:, 0::2] = np.sin(position_enc[1:, 0::2])
    position_enc[1:, 1::2] = np.cos(position_enc[1:, 1::2])
    return jnp.asarray(position_enc, dtype=jnp.float32)


def denoising_kernel(x_ref, emb_ref, w_ref, b_ref, o_ref, *, d):
    """One batch tile of out = L3(relu(L2(relu(L1(x + emb[t]))))).

    x_ref: (TB, DP) f32 — columns [0, d) hold x, column d holds float(t),
    remaining columns are zero. emb/w/b are zero-padded to DP, so the extra
    columns (including the t lane) contribute nothing to the matmuls and the
    padded output lanes stay exactly zero.
    """
    xt = x_ref[...]                                              # (TB, DP)
    tb = xt.shape[0]
    n_t = emb_ref.shape[0]

    # Fused timestep-embedding gather: one_hot(t) @ emb on the MXU.
    t_col = xt[:, d:d + 1].astype(jnp.int32)                     # (TB, 1)
    iota = jax.lax.broadcasted_iota(jnp.int32, (tb, n_t), 1)     # (TB, T)
    onehot = (t_col == iota).astype(jnp.float32)                 # (TB, T)
    emb_t = jnp.dot(onehot, emb_ref[...],
                    preferred_element_type=jnp.float32)          # (TB, DP)

    # MLP: (x + emb[t]) -> linear1 -> relu -> linear2 -> relu -> linear3
    h = xt + emb_t
    h = jnp.dot(h, w_ref[0], preferred_element_type=jnp.float32) + b_ref[0:1, :]
    h = jnp.maximum(h, 0.0)
    h = jnp.dot(h, w_ref[1], preferred_element_type=jnp.float32) + b_ref[1:2, :]
    h = jnp.maximum(h, 0.0)
    h = jnp.dot(h, w_ref[2], preferred_element_type=jnp.float32) + b_ref[2:3, :]
    o_ref[...] = h.astype(o_ref.dtype)


def _choose_tb(batch, max_tb=4096):
    """Batch tile: large enough to amortize the ~0.35 us/step pipeline
    overhead, capped so the double-buffered footprint fits every
    generation's VMEM, and (when possible) >= 2 grid steps so both v7x
    TensorCores get work under dimension_semantics=('parallel',)."""
    if batch <= 8:
        return batch
    half = -(-batch // 2)          # aim for at least 2 grid steps
    half = -(-half // 8) * 8       # round up to the sublane multiple
    return int(min(max_tb, half))


def denoising_forward(x_input, t, params, *, tb=None, max_tb=4096):
    """x_input: [B, D] float32, t: [B] int32 (values in [0, num_timesteps))."""
    emb_p, w_p, b_p = params["emb_pad"], params["w_pad"], params["b_pad"]
    B, D = x_input.shape
    T, DP = emb_p.shape

    # Pad x to the lane width and fold float(t) into spare lane D.
    x_pad = jnp.zeros((B, DP), jnp.float32)
    x_pad = x_pad.at[:, :D].set(x_input.astype(jnp.float32))
    x_pad = x_pad.at[:, D].set(t.astype(jnp.float32))

    if tb is None:
        tb = _choose_tb(B, max_tb)
    grid = (pl.cdiv(B, tb),)

    act_spec = pl.BlockSpec((tb, DP), lambda i: (i, 0))       # per-grid tile
    emb_spec = pl.BlockSpec((T, DP), lambda i: (0, 0))        # VMEM-resident
    w_spec = pl.BlockSpec((3, DP, DP), lambda i: (0, 0, 0))   # VMEM-resident
    b_spec = pl.BlockSpec((3, DP), lambda i: (0, 0))          # VMEM-resident

    out_pad = pl.pallas_call(
        functools.partial(denoising_kernel, d=D),
        out_shape=jax.ShapeDtypeStruct((B, DP), jnp.float32),
        grid=grid,
        in_specs=[act_spec, emb_spec, w_spec, b_spec],
        out_specs=act_spec,
        compiler_params=pltpu.CompilerParams(
            dimension_semantics=("parallel",)   # shard batch grid across TCs (v7x)
        ),
    )(x_pad, emb_p, w_p, b_p)
    return out_pad[:, :D]


def init_params(key, x_dim, num_diffusion_timesteps):
    k1, k2, k3, k4, k5, k6 = jax.random.split(key, 6)
    bound = 1.0 / np.sqrt(x_dim)  # matches torch.nn.Linear default init range
    u = lambda k, shape: jax.random.uniform(
        k, shape, dtype=jnp.float32, minval=-bound, maxval=bound
    )
    # Weights stored as [D_in, D_out] so y = x @ W + b (== PyTorch x @ W_t.T + b).
    w = jnp.stack([u(k1, (x_dim, x_dim)), u(k3, (x_dim, x_dim)), u(k5, (x_dim, x_dim))])
    b = jnp.stack([u(k2, (x_dim,)), u(k4, (x_dim,)), u(k6, (x_dim,))])
    emb = position_encoding_init(num_diffusion_timesteps, x_dim)

    # Zero-pad the feature dim to the lane width (>= x_dim + 1 spare lane for t).
    d_pad = -(-(x_dim + 1) // _LANE) * _LANE
    w_pad = jnp.zeros((3, d_pad, d_pad), jnp.float32).at[:, :x_dim, :x_dim].set(w)
    b_pad = jnp.zeros((3, d_pad), jnp.float32).at[:, :x_dim].set(b)
    emb_pad = jnp.zeros((emb.shape[0], d_pad), jnp.float32).at[:, :x_dim].set(emb)

    return {
        "emb": emb, "w": w, "b": b,                       # unpadded (reference)
        "emb_pad": emb_pad, "w_pad": w_pad, "b_pad": b_pad,  # padded (kernel)
    }


def denoising_reference(x_input, t, params):
    """Pure-JAX reference for the correctness check."""
    h = x_input + jnp.take(params["emb"], t, axis=0)
    h = jnp.maximum(h @ params["w"][0] + params["b"][0], 0.0)
    h = jnp.maximum(h @ params["w"][1] + params["b"][1], 0.0)
    return h @ params["w"][2] + params["b"][2]


if __name__ == "__main__":
    B = 8
    X_DIM = 32
    NUM_TIMESTEPS = 16

    key = jax.random.PRNGKey(0)
    kx, kt, kp = jax.random.split(key, 3)

    x_input = jax.random.normal(kx, (B, X_DIM), dtype=jnp.float32)
    t = jax.random.randint(kt, (B,), 0, NUM_TIMESTEPS, dtype=jnp.int32)
    params = init_params(kp, X_DIM, NUM_TIMESTEPS)

    out = denoising_forward(x_input, t, params)
    out = jax.block_until_ready(out)

    ref = denoising_reference(x_input, t, params)
    np.testing.assert_allclose(np.asarray(out), np.asarray(ref), rtol=1e-5, atol=1e-5)

    print("KERNEL_OK")
</pallas_src>

<mosaic_0001>
module attributes {stable_mosaic.version = 11 : i64} {
  func.func @denoising_kernel(%arg0: i32, %arg1: memref<8x128xf32, #tpu.memory_space<vmem>>, %arg2: memref<16x128xf32, #tpu.memory_space<vmem>>, %arg3: memref<3x128x128xf32, #tpu.memory_space<vmem>>, %arg4: memref<3x128xf32, #tpu.memory_space<vmem>>, %arg5: memref<8x128xf32, #tpu.memory_space<vmem>>) attributes {dimension_semantics = [#tpu.dimension_semantics<parallel>], iteration_bounds = array<i64: 1>, scalar_prefetch = 0 : i64, scratch_operands = 0 : i64, tpu.core_type = #tpu.core_type<tc>, window_params = [{transform_indices = @transform_0, window_bounds = array<i64: 8, 128>}, {pipeline_mode = #tpu.pipeline_mode<synchronous>, transform_indices = @transform_1, window_bounds = array<i64: 16, 128>}, {pipeline_mode = #tpu.pipeline_mode<synchronous>, transform_indices = @transform_2, window_bounds = array<i64: 3, 128, 128>}, {pipeline_mode = #tpu.pipeline_mode<synchronous>, transform_indices = @transform_3, window_bounds = array<i64: 3, 128>}, {transform_indices = @transform_4, window_bounds = array<i64: 8, 128>}]} {
    %c0 = arith.constant 0 : index
    %c0_0 = arith.constant 0 : index
    %0 = vector.load %arg1[%c0, %c0_0] : memref<8x128xf32, #tpu.memory_space<vmem>>, vector<8x128xf32>
    %1 = vector.extract_strided_slice %0 {offsets = [0, 32], sizes = [8, 1], strides = [1, 1]} : vector<8x128xf32> to vector<8x1xf32>
    %2 = arith.fptosi %1 : vector<8x1xf32> to vector<8x1xi32>
    %3 = tpu.iota {dimensions = array<i32: 1>} : vector<8x16xi32>
    %4 = vector.broadcast %2 : vector<8x1xi32> to vector<8x16xi32>
    %5 = arith.cmpi eq, %4, %3 : vector<8x16xi32>
    %6 = arith.extui %5 : vector<8x16xi1> to vector<8x16xi32>
    %7 = arith.sitofp %6 : vector<8x16xi32> to vector<8x16xf32>
    %c0_1 = arith.constant 0 : index
    %c0_2 = arith.constant 0 : index
    %8 = vector.load %arg2[%c0_1, %c0_2] : memref<16x128xf32, #tpu.memory_space<vmem>>, vector<16x128xf32>
    %cst = arith.constant dense<0.000000e+00> : vector<8x128xf32>
    %9 = tpu.matmul %7, %8, %cst {dimension_numbers = #tpu.dot_dimension_numbers<[1], [0], [0], [1], [0, 0, 1, 1], [], []>} : vector<8x16xf32>, vector<16x128xf32>, vector<8x128xf32> -> vector<8x128xf32>
    %10 = arith.addf %0, %9 : vector<8x128xf32>
    %c0_3 = arith.constant 0 : index
    %c0_4 = arith.constant 0 : index
    %c0_5 = arith.constant 0 : index
    %11 = vector.load %arg3[%c0_3, %c0_4, %c0_5] : memref<3x128x128xf32, #tpu.memory_space<vmem>>, vector<1x128x128xf32>
    %12 = vector.shape_cast %11 : vector<1x128x128xf32> to vector<128x128xf32>
    %cst_6 = arith.constant dense<0.000000e+00> : vector<8x128xf32>
    %13 = tpu.matmul %10, %12, %cst_6 {dimension_numbers = #tpu.dot_dimension_numbers<[1], [0], [0], [1], [0, 0, 1, 1], [], []>} : vector<8x128xf32>, vector<128x128xf32>, vector<8x128xf32> -> vector<8x128xf32>
    %c0_7 = arith.constant 0 : index
    %c0_8 = arith.constant 0 : index
    %14 = vector.load %arg4[%c0_7, %c0_8] : memref<3x128xf32, #tpu.memory_space<vmem>>, vector<1x128xf32>
    %15 = vector.broadcast %14 : vector<1x128xf32> to vector<8x128xf32>
    %16 = arith.addf %13, %15 : vector<8x128xf32>
    %cst_9 = arith.constant 0.000000e+00 : f32
    %17 = vector.broadcast %cst_9 : f32 to vector<8x128xf32>
    %18 = arith.maximumf %16, %17 : vector<8x128xf32>
    %c1 = arith.constant 1 : index
    %c0_10 = arith.constant 0 : index
    %c0_11 = arith.constant 0 : index
    %19 = vector.load %arg3[%c1, %c0_10, %c0_11] : memref<3x128x128xf32, #tpu.memory_space<vmem>>, vector<1x128x128xf32>
    %20 = vector.shape_cast %19 : vector<1x128x128xf32> to vector<128x128xf32>
    %cst_12 = arith.constant dense<0.000000e+00> : vector<8x128xf32>
    %21 = tpu.matmul %18, %20, %cst_12 {dimension_numbers = #tpu.dot_dimension_numbers<[1], [0], [0], [1], [0, 0, 1, 1], [], []>} : vector<8x128xf32>, vector<128x128xf32>, vector<8x128xf32> -> vector<8x128xf32>
    %c1_13 = arith.constant 1 : index
    %c0_14 = arith.constant 0 : index
    %22 = vector.load %arg4[%c1_13, %c0_14] : memref<3x128xf32, #tpu.memory_space<vmem>>, vector<1x128xf32>
    %23 = vector.broadcast %22 : vector<1x128xf32> to vector<8x128xf32>
    %24 = arith.addf %21, %23 : vector<8x128xf32>
    %cst_15 = arith.constant 0.000000e+00 : f32
    %25 = vector.broadcast %cst_15 : f32 to vector<8x128xf32>
    %26 = arith.maximumf %24, %25 : vector<8x128xf32>
    %c2 = arith.constant 2 : index
    %c0_16 = arith.constant 0 : index
    %c0_17 = arith.constant 0 : index
    %27 = vector.load %arg3[%c2, %c0_16, %c0_17] : memref<3x128x128xf32, #tpu.memory_space<vmem>>, vector<1x128x128xf32>
    %28 = vector.shape_cast %27 : vector<1x128x128xf32> to vector<128x128xf32>
    %cst_18 = arith.constant dense<0.000000e+00> : vector<8x128xf32>
    %29 = tpu.matmul %26, %28, %cst_18 {dimension_numbers = #tpu.dot_dimension_numbers<[1], [0], [0], [1], [0, 0, 1, 1], [], []>} : vector<8x128xf32>, vector<128x128xf32>, vector<8x128xf32> -> vector<8x128xf32>
    %c2_19 = arith.constant 2 : index
    %c0_20 = arith.constant 0 : index
    %30 = vector.load %arg4[%c2_19, %c0_20] : memref<3x128xf32, #tpu.memory_space<vmem>>, vector<1x128xf32>
    %31 = vector.broadcast %30 : vector<1x128xf32> to vector<8x128xf32>
    %32 = arith.addf %29, %31 : vector<8x128xf32>
    %c0_21 = arith.constant 0 : index
    %c0_22 = arith.constant 0 : index
    %33 = vector.load %arg5[%c0_21, %c0_22] : memref<8x128xf32, #tpu.memory_space<vmem>>, vector<8x128xf32>
    tpu.vector_store %arg5[%c0_21, %c0_22], %32 {strides = array<i32>} : memref<8x128xf32, #tpu.memory_space<vmem>>, vector<8x128xf32>,
    return
  }
  func.func @transform_0(%arg0: i32) -> (i32, i32) {
    %c0_i32 = arith.constant 0 : i32
    %c0_i32_0 = arith.constant 0 : i32
    return %arg0, %c0_i32 : i32, i32
  }
  func.func @transform_1(%arg0: i32) -> (i32, i32) {
    %c0_i32 = arith.constant 0 : i32
    %c0_i32_0 = arith.constant 0 : i32
    %c0_i32_1 = arith.constant 0 : i32
    return %c0_i32, %c0_i32_0 : i32, i32
  }
  func.func @transform_2(%arg0: i32) -> (i32, i32, i32) {
    %c0_i32 = arith.constant 0 : i32
    %c0_i32_0 = arith.constant 0 : i32
    %c0_i32_1 = arith.constant 0 : i32
    %c0_i32_2 = arith.constant 0 : i32
    return %c0_i32, %c0_i32_0, %c0_i32_1 : i32, i32, i32
  }
  func.func @transform_3(%arg0: i32) -> (i32, i32) {
    %c0_i32 = arith.constant 0 : i32
    %c0_i32_0 = arith.constant 0 : i32
    %c0_i32_1 = arith.constant 0 : i32
    return %c0_i32, %c0_i32_0 : i32, i32
  }
  func.func @transform_4(%arg0: i32) -> (i32, i32) {
    %c0_i32 = arith.constant 0 : i32
    %c0_i32_0 = arith.constant 0 : i32
    return %arg0, %c0_i32 : i32, i32
  }
}

</mosaic_0001>

<bundles_post_ra>
// kernel: tpu_custom_call.1
= control target key start
LH: loop header
LB: loop body
LE: loop exit
PB: predicated region body
PF: predicated region fallthrough
CT: control target
= control target key end

     0   :  { %9 = vsyncpa [#allocation3], 0  ;;  %s927_s0 = inlined_call_operand.hbm [shape: f32[8,128], index: 0, kind: input, shape index: {}]   ;;  %s928_s1 = inlined_call_operand.hbm [shape: f32[16,128], index: 1, kind: input, shape index: {}]   ;;  %s929_s2 = inlined_call_operand.hbm [shape: f32[3,128,128], index: 2, kind: input, shape index: {}]   ;;  %s930_s3 = inlined_call_operand.vmem [shape: f32[3,128], index: 3, kind: input, shape index: {}]   ;;  %s931_s4 = inlined_call_operand.hbm [shape: f32[8,128], index: 4, kind: output, shape index: {}]  }
   0x1   :  { %10 = vsyncpa [#allocation6], 0 }
   0x2   :  { %11 = vsyncpa [#allocation4], 0  ;;  %s791_s15 = smov [#allocation5]   ;;  %s697_s19 = scalar_lea.hbm %s928_s1, 256 }
   0x3   :  { %s27_s16 = sshll.u32 %s791_s15, 4  ;;  %p698_p0 = scmp.ne.s32.totalorder %s928_s1, %s697_s19  ;;  %s28_s16 = int_to_ptr.vmem [resolvable:$true] %s27_s16 }
   0x4   :  { %p701_p1 = scmp.lt.u32.totalorder %s697_s19, %s928_s1 }
   0x6   :  { %p703_p2 = pnand %p701_p1, %p698_p0 }
   0x8   :  { %706 = shalt.err (!%p703_p2)
}
   0x9   :  { %s707_s24 = scalar_lea.vmem %s28_s16, 256  ;;  %p712_p4 = scmp.lt.s32.totalorder %s28_s16, %s28_s16 }
   0xa   :  { %p708_p3 = scmp.ne.s32.totalorder %s28_s16, %s707_s24  ;;  %p713_p5 = scmp.lt.s32.totalorder %s707_s24, %s707_s24 }
   0xc   :  { %p714_p6 = por %p713_p5, %p712_p4 }
   0xe   :  { %p715_p7 = pnand %p714_p6, %p708_p3 }
  0x10   :  { %718 = shalt.err (!%p715_p7)
}
  0x11   :  { %s792_s25 = smov 128   ;;  %s793_s26 = smov 8  }
  0x12   :  { %33 = dma.hbm_to_vmem [thread:$0]  %s928_s1, 256, %s28_s16, [#allocation6], %s792_s25, %s792_s25, %s793_s26  }
  0x13   :  { %s794_s29 = smov [#allocation2]   ;;  %s795_s5 = smov [#allocation7]  }
  0x14   :  { %s18_s30 = sshll.u32 %s794_s29, 4  ;;  %s39_s6 = sshll.u32 %s795_s5, 4  ;;  %s19_s30 = int_to_ptr.vmem [resolvable:$true] %s18_s30  ;;  %s40_s6 = int_to_ptr.vmem [resolvable:$true] %s39_s6 }
  0x15   :  { %s719_s9 = scalar_lea.hbm %s927_s0, 128 }
  0x16   :  { %p720_p8 = scmp.ne.s32.totalorder %s927_s0, %s719_s9  ;;  %p723_p9 = scmp.lt.u32.totalorder %s719_s9, %s927_s0 }
  0x18   :  { %p725_p10 = pnand %p723_p9, %p720_p8 }
  0x1a   :  { %728 = shalt.err (!%p725_p10)
}
  0x1b   :  { %s729_s1 = scalar_lea.vmem %s19_s30, 128  ;;  %p734_p12 = scmp.lt.s32.totalorder %s19_s30, %s19_s30 }
  0x1c   :  { %p730_p11 = scmp.ne.s32.totalorder %s19_s30, %s729_s1  ;;  %p735_p13 = scmp.lt.s32.totalorder %s729_s1, %s729_s1 }
  0x1e   :  { %p736_p0 = por %p735_p13, %p734_p12 }
  0x20   :  { %p737_p1 = pnand %p736_p0, %p730_p11 }
  0x22   :  { %740 = shalt.err (!%p737_p1)
}
  0x23   :  { %21 = dma.hbm_to_vmem [thread:$0]  %s927_s0, 128, %s19_s30, [#allocation3]  }
  0x24   :  { %s741_s18 = scalar_lea.hbm %s929_s2, 6144 }
  0x25   :  { %p742_p2 = scmp.ne.s32.totalorder %s929_s2, %s741_s18  ;;  %p745_p3 = scmp.lt.u32.totalorder %s741_s18, %s929_s2 }
  0x27   :  { %p747_p4 = pnand %p745_p3, %p742_p2 }
  0x29   :  { %750 = shalt.err (!%p747_p4)
}
  0x2a   :  { %s751_s23 = scalar_lea.vmem %s40_s6, 6144  ;;  %p756_p6 = scmp.lt.s32.totalorder %s40_s6, %s40_s6 }
  0x2b   :  { %p752_p5 = scmp.ne.s32.totalorder %s40_s6, %s751_s23  ;;  %p757_p7 = scmp.lt.s32.totalorder %s751_s23, %s751_s23 }
  0x2d   :  { %p758_p8 = por %p757_p7, %p756_p6 }
  0x2f   :  { %p759_p9 = pnand %p758_p8, %p752_p5 }
  0x31   :  { %762 = shalt.err (!%p759_p9)
}
  0x32   :  { %45 = dma.hbm_to_vmem [thread:$0]  %s929_s2, 6144, %s40_s6, [#allocation6], %s792_s25, %s792_s25, %s793_s26  }
  0x33   :  { %785 = dma.done.wait [#allocation3], 128  }
  0x34   :  { %786 = vsyncadd [#allocation3], 4294967168 }
  0x35   :  { %787 = dma.done.wait [#allocation6], 6400  }
  0x36   :  { %788 = vsyncadd [#allocation6], 4294960896  ;;  %v796_v0 = vmov 32   ;;  %v797_v1 = vmov 0.0|0.0   ;;  %v870_v2 = vld [vmem:[#allocation2] sm:$0xff]  ;;  %v67_v3 = vld [vmem:[#allocation5] sm:$0xff]  ;;  %v59_v30 = vlaneseq }
  0x37   :  { %696 = vset.pattern.permute.xlu0 %v796_v0  ;;  %609 = vmatprep.subr.bf16.mxu0 %v797_v1  ;;  %v68_v4 = vld [vmem:[#allocation5 + $0x8] sm:$0xff]  ;;  %v684_v5 = vtrunc.f32 %v870_v2  ;;  %vm798_vm0 = vmmov 0   ;;  %v799_v8 = vmov 0.0   ;;  %v144_v9 = vld [vmem:[#allocation7] sm:$0xff]  ;;  %v145_v10 = vld [vmem:[#allocation7 + $0x8] sm:$0xff]  ;;  %vm69_vm1 = vcmask 130048  }
  0x38   :  { %612 = vmatprep.subr.bf16.mxu1 %v797_v1  ;;  %v610_v6 = vpack.c.bf16 %v68_v4, %v67_v3  ;;  %501 = vmatprep.mubr.msk.f32.mxu0 %vm798_vm0, %v799_v8  ;;  %v146_v11 = vld [vmem:[#allocation7 + $0x10] sm:$0xff]  ;;  %v613_v12 = vpack.c.bf16 %v145_v10, %v144_v9  ;;  %v147_v13 = vld [vmem:[#allocation7 + $0x18] sm:$0xff]  ;;  %v148_v15 = vld [vmem:[#allocation7 + $0x20] sm:$0xff]  ;;  %v60_v31 = vand.u32 127, %v59_v30  ;;  %s800_s30 = smov [#allocation8]  }
  0x39   :  { %v685_v7 = vcvt.f32.s32 %v684_v5  ;;  %536 = vmatprep.mubr.msk.f32.mxu1 %vm798_vm0, %v799_v8  ;;  %v616_v14 = vpack.c.bf16 %v147_v13, %v146_v11  ;;  %v149_v16 = vld [vmem:[#allocation7 + $0x28] sm:$0xff]  ;;  %v150_v18 = vld [vmem:[#allocation7 + $0x30] sm:$0xff]  ;;  %v151_v19 = vld [vmem:[#allocation7 + $0x38] sm:$0xff]  ;;  %s428_s5 = sshll.u32 %s800_s30, 4  ;;  %s429_s5 = int_to_ptr.vmem [resolvable:$true] %s428_s5 }
  0x3a   :  { %611 = vmatpush3.bf16.msra.mxu0 %v610_v6  ;;  %614 = vmatpush3.bf16.msra.mxu1 %v613_v12  ;;  %v619_v17 = vpack.c.bf16 %v149_v16, %v148_v15  ;;  %v622_v20 = vpack.c.bf16 %v151_v19, %v150_v18  ;;  %v152_v21 = vld [vmem:[#allocation7 + $0x40] sm:$0xff]  ;;  %v153_v22 = vld [vmem:[#allocation7 + $0x48] sm:$0xff]  ;;  %v154_v24 = vld [vmem:[#allocation7 + $0x50] sm:$0xff]  ;;  %s763_s6 = scalar_lea.vmem %s429_s5, 128  ;;  %p768_p11 = scmp.lt.s32.totalorder %s429_s5, %s429_s5 }
  0x3b   :  { %636 = vmatprep.subr.bf16.mxu0 %v797_v1  ;;  %62 = vperm.xlu0 %696, %v685_v7   ;;  %v625_v23 = vpack.c.bf16 %v153_v22, %v152_v21  ;;  %v155_v25 = vld [vmem:[#allocation7 + $0x58] sm:$0xff]  ;;  %v156_v27 = vld [vmem:[#allocation7 + $0x60] sm:$0xff]  ;;  %v157_v28 = vld [vmem:[#allocation7 + $0x68] sm:$0xff]  ;;  %p764_p10 = scmp.ne.s32.totalorder %s429_s5, %s763_s6  ;;  %p769_p12 = scmp.lt.s32.totalorder %s763_s6, %s763_s6 }
  0x3c   :  { %615 = vmatprep.subr.bf16.mxu1 %v797_v1  ;;  %v628_v26 = vpack.c.bf16 %v155_v25, %v154_v24  ;;  %v631_v29 = vpack.c.bf16 %v157_v28, %v156_v27  ;;  %v158_v34 = vld [vmem:[#allocation7 + $0x70] sm:$0xff]  ;;  %v159_v35 = vld [vmem:[#allocation7 + $0x78] sm:$0xff]  ;;  %v237_v37 = vld [vmem:[#allocation7 + $0x80] sm:$0xff] }
  0x3d   :  { %v634_v36 = vpack.c.bf16 %v159_v35, %v158_v34  ;;  %v238_v38 = vld [vmem:[#allocation7 + $0x88] sm:$0xff]  ;;  %v239_v39 = vld [vmem:[#allocation7 + $0x90] sm:$0xff]  ;;  %v240_v41 = vld [vmem:[#allocation7 + $0x98] sm:$0xff]  ;;  %p770_p13 = por %p769_p12, %p768_p11 }
  0x3e   :  { %617 = vmatpush3.bf16.msra.mxu1 %v616_v14  ;;  %v637_v40 = vpack.c.bf16 %v238_v38, %v237_v37  ;;  %v640_v42 = vpack.c.bf16 %v240_v41, %v239_v39  ;;  %v241_v43 = vld [vmem:[#allocation7 + $0xa0] sm:$0xff]  ;;  %v242_v44 = vld [vmem:[#allocation7 + $0xa8] sm:$0xff]  ;;  %v243_v46 = vld [vmem:[#allocation7 + $0xb0] sm:$0xff] }
  0x3f   :  { %618 = vmatprep.subr.bf16.mxu1 %v797_v1  ;;  %v643_v45 = vpack.c.bf16 %v242_v44, %v241_v43  ;;  %v244_v47 = vld [vmem:[#allocation7 + $0xb8] sm:$0xff]  ;;  %v245_v49 = vld [vmem:[#allocation7 + $0xc0] sm:$0xff]  ;;  %v246_v50 = vld [vmem:[#allocation7 + $0xc8] sm:$0xff]  ;;  %p771_p0 = pnand %p770_p13, %p764_p10 }
  0x40   :  { %v646_v48 = vpack.c.bf16 %v244_v47, %v243_v46  ;;  %v649_v51 = vpack.c.bf16 %v246_v50, %v245_v49  ;;  %v247_v52 = vld [vmem:[#allocation7 + $0xd0] sm:$0xff]  ;;  %v248_v53 = vld [vmem:[#allocation7 + $0xd8] sm:$0xff]  ;;  %v249_v55 = vld [vmem:[#allocation7 + $0xe0] sm:$0xff] }
  0x41   :  { %v652_v54 = vpack.c.bf16 %v248_v53, %v247_v52  ;;  %v250_v56 = vld [vmem:[#allocation7 + $0xe8] sm:$0xff]  ;;  %v251_v61 = vld [vmem:[#allocation7 + $0xf0] sm:$0xff]  ;;  %v252_v62 = vld [vmem:[#allocation7 + $0xf8] sm:$0xff] }
  0x42   :  { %620 = vmatpush3.bf16.msra.mxu1 %v619_v17  ;;  %v655_v57 = vpack.c.bf16 %v250_v56, %v249_v55  ;;  %v658_v63 = vpack.c.bf16 %v252_v62, %v251_v61  ;;  %v330_v0 = vld [vmem:[#allocation7 + $0x100] sm:$0xff]  ;;  %v331_v3 = vld [vmem:[#allocation7 + $0x108] sm:$0xff]  ;;  %v332_v4 = vld [vmem:[#allocation7 + $0x110] sm:$0xff] }
  0x43   :  { %621 = vmatprep.subr.bf16.mxu1 %v797_v1  ;;  %v661_v5 = vpack.c.bf16 %v331_v3, %v330_v0  ;;  %v333_v6 = vld [vmem:[#allocation7 + $0x118] sm:$0xff]  ;;  %v334_v9 = vld [vmem:[#allocation7 + $0x120] sm:$0xff]  ;;  %v339_v14 = vld [vmem:[#allocation7 + $0x148] sm:$0xff] }
  0x44   :  { %v664_v7 = vpack.c.bf16 %v333_v6, %v332_v4  ;;  %v337_v11 = vld [vmem:[#allocation7 + $0x138] sm:$0xff]  ;;  %v338_v13 = vld [vmem:[#allocation7 + $0x140] sm:$0xff]  ;;  %v340_v16 = vld [vmem:[#allocation7 + $0x150] sm:$0xff] }
  0x45   :  { %v673_v15 = vpack.c.bf16 %v339_v14, %v338_v13  ;;  %v341_v17 = vld [vmem:[#allocation7 + $0x158] sm:$0xff]  ;;  %v342_v19 = vld [vmem:[#allocation7 + $0x160] sm:$0xff]  ;;  %v440_v22 = vld [vmem:[%s930_s3] ss:$0 sm:$0xff] }
  0x46   :  { %623 = vmatpush3.bf16.msra.mxu1 %v622_v20  ;;  %v676_v18 = vpack.c.bf16 %v341_v17, %v340_v16  ;;  %v343_v20 = vld [vmem:[#allocation7 + $0x168] sm:$0xff]  ;;  %v344_v27 = vld [vmem:[#allocation7 + $0x170] sm:$0xff]  ;;  %v345_v28 = vld [vmem:[#allocation7 + $0x178] sm:$0xff] }
  0x47   :  { %624 = vmatprep.subr.bf16.mxu1 %v797_v1  ;;  %v679_v21 = vpack.c.bf16 %v343_v20, %v342_v19  ;;  %v441_v30 = vld [vmem:[%s930_s3 + $0x1] ss:$0 sm:$0xff]  ;;  %v442_v34 = vld [vmem:[%s930_s3 + $0x2] ss:$0 sm:$0xff] }
  0x4a   :  { %626 = vmatpush3.bf16.msra.mxu1 %v625_v23 }
  0x4b   :  { %627 = vmatprep.subr.bf16.mxu1 %v797_v1 }
  0x4e   :  { %629 = vmatpush3.bf16.msra.mxu1 %v628_v26 }
  0x4f   :  { %630 = vmatprep.subr.bf16.mxu1 %v797_v1 }
  0x52   :  { %632 = vmatpush3.bf16.msra.mxu1 %v631_v29  ;;  %v682_v29 = vpack.c.bf16 %v345_v28, %v344_v27 }
  0x53   :  { %633 = vmatprep.subr.bf16.mxu1 %v797_v1 }
  0x56   :  { %635 = vmatpush3.bf16.msra.mxu1 %v634_v36 }
  0x57   :  { %660 = vmatprep.subr.bf16.mxu1 %v797_v1 }
  0xba   :  { %v63_v32 = vpop.permute.xlu0 %62 }
  0xbb   :  { %vm64_vm2 = vcmp.eq.s32.totalorder %v63_v32, %v60_v31 }
  0xbc   :  { %v438_v33 = vsel %vm64_vm2, 1.0, %v799_v8 }
  0xbd   :  { %502 = vmatmul.mubr.msk.f32.vlgmr.msra.gmra.mrb[0].mxu0 %vm69_vm1, %v438_v33 }
  0xbe   :  { %571 = vmatprep.mubr.msk.f32.mxu0 %vm798_vm0, %v799_v8  ;;  %638 = vmatpush3.bf16.msra.mxu0 %v637_v40 }
  0xbf   :  { %639 = vmatprep.subr.bf16.mxu0 %v797_v1 }
  0xc2   :  { %641 = vmatpush3.bf16.msra.mxu0 %v640_v42 }
  0xc3   :  { %642 = vmatprep.subr.bf16.mxu0 %v797_v1 }
  0xc6   :  { %644 = vmatpush3.bf16.msra.mxu0 %v643_v45 }
  0xc7   :  { %645 = vmatprep.subr.bf16.mxu0 %v797_v1 }
  0xca   :  { %647 = vmatpush3.bf16.msra.mxu0 %v646_v48 }
  0xcb   :  { %648 = vmatprep.subr.bf16.mxu0 %v797_v1 }
  0xce   :  { %650 = vmatpush3.bf16.msra.mxu0 %v649_v51 }
  0xcf   :  { %651 = vmatprep.subr.bf16.mxu0 %v797_v1 }
  0xd2   :  { %653 = vmatpush3.bf16.msra.mxu0 %v652_v54 }
  0xd3   :  { %654 = vmatprep.subr.bf16.mxu0 %v797_v1 }
  0xd6   :  { %656 = vmatpush3.bf16.msra.mxu0 %v655_v57 }
  0xd7   :  { %657 = vmatprep.subr.bf16.mxu0 %v797_v1 }
  0xda   :  { %659 = vmatpush3.bf16.msra.mxu0 %v658_v63 }
 0x190   :  { %v139_v58 = vpop.f32.mrb[0].mxu0 }
 0x191   :  { %v143_v59 = vadd.f32 %v139_v58, %v870_v2  ;;  %v503_v60 = vpop.f32.mrb[1].mxu0  ;;  %v335_v2 = vld [vmem:[#allocation7 + $0x128] sm:$0xff] }
 0x192   :  { %v667_v10 = vpack.c.bf16 %v335_v2, %v334_v9 }
 0x193   :  { %537 = vmatmul.mubr.f32.vlgmr.msra.gmra.mrb[0].mxu1 %v143_v59 }
 0x194   :  { %606 = vmatprep.mubr.msk.f32.mxu1 %vm798_vm0, %v799_v8  ;;  %662 = vmatpush3.bf16.msra.mxu1 %v661_v5  ;;  %v336_v8 = vld [vmem:[#allocation7 + $0x130] sm:$0xff] }
 0x195   :  { %663 = vmatprep.subr.bf16.mxu1 %v797_v1  ;;  %v670_v12 = vpack.c.bf16 %v337_v11, %v336_v8 }
 0x198   :  { %665 = vmatpush3.bf16.msra.mxu1 %v664_v7 }
 0x199   :  { %666 = vmatprep.subr.bf16.mxu1 %v797_v1 }
 0x19c   :  { %668 = vmatpush3.bf16.msra.mxu1 %v667_v10 }
 0x19d   :  { %669 = vmatprep.subr.bf16.mxu1 %v797_v1 }
 0x1a0   :  { %671 = vmatpush3.bf16.msra.mxu1 %v670_v12 }
 0x1a1   :  { %672 = vmatprep.subr.bf16.mxu1 %v797_v1 }
 0x1a4   :  { %674 = vmatpush3.bf16.msra.mxu1 %v673_v15 }
 0x1a5   :  { %675 = vmatprep.subr.bf16.mxu1 %v797_v1 }
 0x1a8   :  { %677 = vmatpush3.bf16.msra.mxu1 %v676_v18 }
 0x1a9   :  { %678 = vmatprep.subr.bf16.mxu1 %v797_v1 }
 0x1ac   :  { %680 = vmatpush3.bf16.msra.mxu1 %v679_v21 }
 0x1ad   :  { %681 = vmatprep.subr.bf16.mxu1 %v797_v1 }
 0x1b0   :  { %683 = vmatpush3.bf16.msra.mxu1 %v682_v29 }
 0x266   :  { %v231_v23 = vpop.f32.mrb[0].mxu1 }
 0x267   :  { %v232_v24 = vadd.f32 %v440_v22, %v231_v23  ;;  %v538_v25 = vpop.f32.mrb[1].mxu1 }
 0x269   :  { %v235_v26 = vmax.f32 %v232_v24, 0.0 }
 0x26b   :  { %572 = vmatmul.mubr.f32.vlgmr.msra.gmra.mrb[2].mxu0 %v235_v26 }
 0x33e   :  { %v324_v31 = vpop.f32.mrb[2].mxu0 }
 0x33f   :  { %v325_v32 = vadd.f32 %v441_v30, %v324_v31  ;;  %v573_v1 = vpop.f32.mrb[3].mxu0 }
 0x341   :  { %v328_v33 = vmax.f32 %v325_v32, 0.0 }
 0x343   :  { %607 = vmatmul.mubr.f32.vlgmr.msra.gmra.mrb[2].mxu1 %v328_v33 }
 0x416   :  { %v417_v35 = vpop.f32.mrb[2].mxu1 }
 0x417   :  { %v418_v36 = vadd.f32 %v442_v34, %v417_v35  ;;  %v608_v37 = vpop.f32.mrb[3].mxu1 }
 0x419   :  { %421 = vst [vmem:[#allocation8] sm:$0xff] %v418_v36 }
 0x41a   :  { %774 = shalt.err (!%p771_p0)
}
 0x41b   :  { %s775_s9 = scalar_lea.hbm %s931_s4, 128 }
 0x41c   :  { %p776_p1 = scmp.ne.s32.totalorder %s931_s4, %s775_s9  ;;  %p779_p2 = scmp.lt.u32.totalorder %s775_s9, %s931_s4 }
 0x41e   :  { %p781_p3 = pnand %p779_p2, %p776_p1 }
 0x420   :  { %784 = shalt.err (!%p781_p3)
}
 0x421   :  { %431 = dma.vmem_to_hbm [thread:$0]  %s429_s5, 128, %s931_s4, [#allocation4]  }
 0x422   :  { %789 = dma.done.wait [#allocation4], 128  }
 0x423   :  { %790 = vsyncadd [#allocation4], 4294967168 }
 0x424   :  { %435 = vsyncpa [#allocation3], 1 }
 0x425   :  { %436 = vsyncpa [#allocation6], 1 }
 0x426   :  { %437 = vsyncpa [#allocation4], 1 }

</bundles_post_ra>
